<compile_context>
chip_gen: v6e
topology: v6e:2x2x1
jax: 0.10.0
libtpu: 0.0.40
codegen_flags: <defaults>
</compile_context>

<pallas_src>
import functools

import jax
import jax.numpy as jnp
from jax.experimental import pallas as pl
from jax.experimental.pallas import tpu as pltpu

_LANES = 128
_ROW_ALIGN = 32                # sublane-tile safe for f32 (8), bf16 (16) and int8 (32)
_DEF_BLOCK_BYTES = 8 << 20     # combined x+t bytes per grid block (Pallas double-buffers them)
_DEF_MAX_BLOCK_ROWS = 8192
_MIN_GRID_BLOCKS = 8           # >= 2 TensorCores (v7x) x ~4 pipeline steps


def _stable_bce_with_logits(x, z):
    # Same numerically-stable form as torch.binary_cross_entropy_with_logits:
    #   max(x, 0) - x*z + log1p(exp(-|x|))
    return jnp.maximum(x, 0.0) - x * z + jnp.log1p(jnp.exp(-jnp.abs(x)))


def _emit_partial_sum(loss, out_ref, block_rows, valid_rows):
    """Write this block's partial sum; mask the garbage tail only on the last block."""
    if valid_rows % block_rows == 0:       # static: grid covers the array exactly
        out_ref[0, 0] = jnp.sum(loss)
        return

    i = pl.program_id(0)
    last = i == pl.num_programs(0) - 1

    @pl.when(last)
    def _():
        rows = jax.lax.broadcasted_iota(jnp.int32, loss.shape, 0) + i * block_rows
        # jnp.where (not multiply) so NaN/Inf from undefined tail data cannot leak in.
        out_ref[0, 0] = jnp.sum(jnp.where(rows < valid_rows, loss, 0.0))

    @pl.when(jnp.logical_not(last))
    def _():
        out_ref[0, 0] = jnp.sum(loss)


def _wbce_dense_kernel(*refs, block_rows, valid_rows, has_w):
    """Multi-label targets (float / int8). One partial sum per grid block."""
    if has_w:
        x_ref, t_ref, w_ref, out_ref = refs
    else:
        x_ref, t_ref, out_ref = refs
        w_ref = None
    x = x_ref[...].astype(jnp.float32)
    z = t_ref[...].astype(jnp.float32)
    loss = _stable_bce_with_logits(x, z)
    if w_ref is not None:
        loss = loss * w_ref[...].astype(jnp.float32)
    _emit_partial_sum(loss, out_ref, block_rows, valid_rows)


def _wbce_onehot_kernel(*refs, block_rows, valid_rows, has_w):
    """Integer class labels: the one-hot is folded into a select inside the kernel."""
    if has_w:
        x_ref, lbl_ref, w_ref, out_ref = refs
    else:
        x_ref, lbl_ref, out_ref = refs
        w_ref = None
    x = x_ref[...].astype(jnp.float32)          # (TM, C)
    lbl = lbl_ref[...]                          # (TM, 1) int32
    cols = jax.lax.broadcasted_iota(jnp.int32, x.shape, 1)
    loss = (jnp.maximum(x, 0.0)
            + jnp.where(cols == lbl, -x, 0.0)   # == -x * one_hot(lbl)
            + jnp.log1p(jnp.exp(-jnp.abs(x))))
    if w_ref is not None:
        loss = loss * w_ref[...].astype(jnp.float32)
    _emit_partial_sum(loss, out_ref, block_rows, valid_rows)


def _choose_tm(total_rows, bytes_per_row, block_bytes, max_block_rows,
               min_blocks=_MIN_GRID_BLOCKS):
    """Row-block size: ~block_bytes per grid step, aligned, but keep >= min_blocks steps."""
    if total_rows <= _ROW_ALIGN:
        return total_rows                                    # single full-dim block
    tm = block_bytes // max(bytes_per_row, 1)
    tm = min(tm, max_block_rows, total_rows)
    if min_blocks > 1:
        tm = min(tm, pl.cdiv(total_rows, min_blocks))        # keep both v7x cores fed
    tm = max(_ROW_ALIGN, tm // _ROW_ALIGN * _ROW_ALIGN)
    tm = min(tm, total_rows // _ROW_ALIGN * _ROW_ALIGN)
    return tm


def _vmem_limit_bytes(vmem_need_bytes):
    try:
        cap = int(getattr(pltpu.get_tpu_info(), "vmem_capacity_bytes", 128 << 20))
    except Exception:
        cap = 64 << 20
    hard_cap = int(cap * 0.70)          # leave headroom for Mosaic scratch (v7x: ~44 MiB)
    want = max(2 * int(vmem_need_bytes), 16 << 20)
    return max(min(want, hard_cap), 4 << 20)


def _pallas_partial_sums(kernel, arrays, in_specs, num_blocks, vmem_need_bytes,
                         flops, transcendentals, bytes_accessed):
    partials = pl.pallas_call(
        kernel,
        out_shape=jax.ShapeDtypeStruct((num_blocks, 1), jnp.float32),
        grid=(num_blocks,),
        in_specs=in_specs,
        out_specs=pl.BlockSpec((1, 1), lambda i: (i, 0),
                               memory_space=pltpu.MemorySpace.SMEM),
        compiler_params=pltpu.CompilerParams(
            dimension_semantics=("parallel",),
            vmem_limit_bytes=_vmem_limit_bytes(vmem_need_bytes),
        ),
        cost_estimate=pl.CostEstimate(
            flops=int(flops),
            transcendentals=int(transcendentals),
            bytes_accessed=int(bytes_accessed),
        ),
    )(*arrays)
    return jnp.sum(partials)


def weighted_bce_loss(inputs, targets, class_weights=None, reduction="mean", *,
                      max_block_rows=_DEF_MAX_BLOCK_ROWS, block_bytes=_DEF_BLOCK_BYTES):
    """JAX/Pallas equivalent of WeightedBCELoss.forward for 'mean' / 'sum' reductions.

    inputs:  (N, C) float logits (f32 or bf16; dtype streams straight to the kernel)
    targets: (N, C) multi-label targets (float / bool / int8), or (N,) integer class indices
    class_weights: optional (C,) per-class weights
    """
    inputs = jnp.asarray(inputs)
    if inputs.ndim != 2:
        raise ValueError("inputs must be (N, C)")
    if not jnp.issubdtype(inputs.dtype, jnp.floating):
        inputs = inputs.astype(jnp.float32)
    n, c = inputs.shape

    if reduction == "mean":
        scale = 1.0 / float(n * c)
    elif reduction == "sum":
        scale = 1.0
    else:
        # TODO(synk): reduction='none' (elementwise (N, C) output) is not wired through this
        # partial-sum kernel; only 'mean' and 'sum' are supported here.
        raise NotImplementedError("only 'mean' and 'sum' reductions implemented")

    has_w = class_weights is not None
    w = jnp.asarray(class_weights, jnp.float32).reshape(c) if has_w else None

    targets = jnp.asarray(targets)
    elem_flops = 6 * n * c
    elem_trans = 2 * n * c

    # ---------------- integer class labels: in-kernel one-hot ----------------
    if targets.ndim == 1:
        if not jnp.issubdtype(targets.dtype, jnp.integer):
            raise ValueError("1-D targets must be integer class indices (as in F.one_hot)")
        labels = targets.astype(jnp.int32).reshape(n, 1)
        bytes_per_row = c * inputs.dtype.itemsize + 4
        tm = _choose_tm(n, bytes_per_row, block_bytes, max_block_rows)
        num_blocks = pl.cdiv(n, tm)
        arrays = [inputs, labels]
        in_specs = [pl.BlockSpec((tm, c), lambda i: (i, 0)),
                    pl.BlockSpec((tm, 1), lambda i: (i, 0))]
        if has_w:
            arrays.append(w.reshape(1, c))
            in_specs.append(pl.BlockSpec((1, c), lambda i: (0, 0)))
        kernel = functools.partial(_wbce_onehot_kernel, block_rows=tm,
                                   valid_rows=n, has_w=has_w)
        # the (tm, 1) int32 label block occupies a full (tm, 128)-lane VMEM tile; count it.
        vmem_need = 2 * tm * (c * inputs.dtype.itemsize + _LANES * 4) + c * 4 + (1 << 20)
        bytes_acc = inputs.nbytes + labels.nbytes + (w.nbytes if has_w else 0) + num_blocks * 4
        total = _pallas_partial_sums(kernel, arrays, in_specs, num_blocks, vmem_need,
                                     elem_flops, elem_trans, bytes_acc)
        return total * scale

    # ---------------- multi-label targets ----------------
    if targets.shape != (n, c):
        raise ValueError("targets must match inputs shape (N, C) or be (N,) class indices")
    if targets.dtype == jnp.bool_:
        targets = targets.astype(jnp.int8)       # keep the HBM stream narrow (1 B/elem)
    elif not (jnp.issubdtype(targets.dtype, jnp.floating) or targets.dtype == jnp.int8):
        targets = targets.astype(jnp.float32)

    # Lane-dense packing (no copies): (N, C) viewed as (N*C/128, 128) when it tiles exactly.
    lane_packed = c <= _LANES and _LANES % c == 0 and (n * c) % _LANES == 0
    if lane_packed:
        rows, cols = (n * c) // _LANES, _LANES
        x2 = inputs.reshape(rows, cols)
        t2 = targets.reshape(rows, cols)
        w2 = jnp.tile(w, _LANES // c).reshape(1, cols) if has_w else None
    else:
        rows, cols = n, c                        # last block dim = full C, no column padding
        x2, t2 = inputs, targets
        w2 = w.reshape(1, cols) if has_w else None

    bytes_per_row = cols * (x2.dtype.itemsize + t2.dtype.itemsize)
    # TODO(synk): extremely wide C (where even a 32-row block exceeds block_bytes) would need a
    # second, column grid dimension; multi-label class counts are assumed modest here.
    tm = _choose_tm(rows, bytes_per_row, block_bytes, max_block_rows)
    num_blocks = pl.cdiv(rows, tm)
    arrays = [x2, t2]
    in_specs = [pl.BlockSpec((tm, cols), lambda i: (i, 0)),
                pl.BlockSpec((tm, cols), lambda i: (i, 0))]
    if has_w:
        arrays.append(w2)
        in_specs.append(pl.BlockSpec((1, cols), lambda i: (0, 0)))
    kernel = functools.partial(_wbce_dense_kernel, block_rows=tm,
                               valid_rows=rows, has_w=has_w)
    vmem_need = 2 * tm * bytes_per_row + cols * 4 + (1 << 20)
    bytes_acc = x2.nbytes + t2.nbytes + (w2.nbytes if has_w else 0) + num_blocks * 4
    total = _pallas_partial_sums(kernel, arrays, in_specs, num_blocks, vmem_need,
                                 elem_flops, elem_trans, bytes_acc)
    return total * scale


def _reference(inputs, targets, class_weights=None, reduction="mean"):
    """Pure-JAX reference mirroring torch.nn.functional.binary_cross_entropy_with_logits."""
    x = jnp.asarray(inputs, jnp.float32)
    targets = jnp.asarray(targets)
    if targets.ndim == 1:
        z = jax.nn.one_hot(targets, x.shape[1], dtype=jnp.float32)
    else:
        z = targets.astype(jnp.float32)
    loss = jnp.maximum(x, 0.0) - x * z + jnp.log1p(jnp.exp(-jnp.abs(x)))
    if class_weights is not None:
        loss = loss * jnp.asarray(class_weights, jnp.float32)[None, :]
    return loss.mean() if reduction == "mean" else loss.sum()


if __name__ == "__main__":
    key = jax.random.PRNGKey(0)
    k1, k2, k3, k4, k5 = jax.random.split(key, 5)

    # Case 1: tiny multi-label batch, f32, class weights, 'mean' (lane-packed, single block).
    N, C = 8, 16
    logits = jax.random.normal(k1, (N, C), jnp.float32)
    targets = (jax.random.uniform(k2, (N, C)) > 0.5).astype(jnp.float32)
    cw = 0.5 + jax.random.uniform(k3, (C,), jnp.float32)
    out = jax.block_until_ready(weighted_bce_loss(logits, targets, cw, "mean"))
    ref = _reference(logits, targets, cw, "mean")
    assert jnp.allclose(out, ref, rtol=1e-5, atol=1e-5), (out, ref)

    # Case 2: 'sum' reduction, no class weights (specialized no-weight kernel).
    out2 = jax.block_until_ready(weighted_bce_loss(logits, targets, None, "sum"))
    ref2 = _reference(logits, targets, None, "sum")
    assert jnp.allclose(out2, ref2, rtol=1e-5, atol=1e-4), (out2, ref2)

    # Case 3: integer class labels -> in-kernel one-hot path, with class weights.
    N3, C3 = 16, 32
    lg3 = jax.random.normal(k2, (N3, C3), jnp.float32)
    lb3 = jax.random.randint(k4, (N3,), 0, C3)
    cw3 = 0.5 + jax.random.uniform(k3, (C3,), jnp.float32)
    out3 = jax.block_until_ready(weighted_bce_loss(lg3, lb3, cw3, "mean"))
    ref3 = _reference(lg3, lb3, cw3, "mean")
    assert jnp.allclose(out3, ref3, rtol=1e-5, atol=1e-5), (out3, ref3)

    # Case 4: bf16 logits + bool targets (streamed as int8); N*C not a multiple of 128 so the
    #         generic full-C path is used, multi-block grid with a masked tail block.
    N4, C4 = 250, 16
    lg4 = jax.random.normal(k1, (N4, C4), jnp.float32).astype(jnp.bfloat16)
    tg4 = jax.random.uniform(k2, (N4, C4)) > 0.5
    cw4 = 0.5 + jax.random.uniform(k3, (C4,), jnp.float32)
    out4 = jax.block_until_ready(weighted_bce_loss(lg4, tg4, cw4, "mean"))
    ref4 = _reference(lg4, tg4, cw4, "mean")
    assert jnp.allclose(out4, ref4, rtol=1e-3, atol=1e-3), (out4, ref4)

    # Case 5: lane-packed path with a multi-block grid and a masked tail block, 'sum'.
    N5, C5 = 576, 16
    lg5 = jax.random.normal(k4, (N5, C5), jnp.float32)
    tg5 = (jax.random.uniform(k5, (N5, C5)) > 0.5).astype(jnp.float32)
    cw5 = 0.5 + jax.random.uniform(k3, (C5,), jnp.float32)
    out5 = jax.block_until_ready(weighted_bce_loss(lg5, tg5, cw5, "sum"))
    ref5 = _reference(lg5, tg5, cw5, "sum")
    assert jnp.allclose(out5, ref5, rtol=1e-5, atol=1e-2), (out5, ref5)

    print("KERNEL_OK")
</pallas_src>

<mosaic_0001>
module attributes {stable_mosaic.version = 11 : i64} {
  func.func @_wbce_dense_kernel(%arg0: i32, %arg1: memref<1x128xf32, #tpu.memory_space<vmem>>, %arg2: memref<1x128xf32, #tpu.memory_space<vmem>>, %arg3: memref<1x128xf32, #tpu.memory_space<vmem>>, %arg4: memref<1x1xf32, #tpu.memory_space<smem>>) attributes {dimension_semantics = [#tpu.dimension_semantics<parallel>], iteration_bounds = array<i64: 1>, scalar_prefetch = 0 : i64, scratch_operands = 0 : i64, tpu.core_type = #tpu.core_type<tc>, window_params = [{transform_indices = @transform_0, window_bounds = array<i64: 1, 128>}, {transform_indices = @transform_1, window_bounds = array<i64: 1, 128>}, {pipeline_mode = #tpu.pipeline_mode<synchronous>, transform_indices = @transform_2, window_bounds = array<i64: 1, 128>}, {transform_indices = @transform_3, window_bounds = array<i64: 1, 1>}]} {
    %c0 = arith.constant 0 : index
    %c0_0 = arith.constant 0 : index
    %0 = vector.load %arg1[%c0, %c0_0] : memref<1x128xf32, #tpu.memory_space<vmem>>, vector<1x128xf32>
    %c0_1 = arith.constant 0 : index
    %c0_2 = arith.constant 0 : index
    %1 = vector.load %arg2[%c0_1, %c0_2] : memref<1x128xf32, #tpu.memory_space<vmem>>, vector<1x128xf32>
    %cst = arith.constant 0.000000e+00 : f32
    %2 = vector.broadcast %cst : f32 to vector<1x128xf32>
    %3 = arith.maximumf %0, %2 : vector<1x128xf32>
    %4 = arith.mulf %0, %1 : vector<1x128xf32>
    %5 = arith.subf %3, %4 : vector<1x128xf32>
    %6 = math.absf %0 : vector<1x128xf32>
    %cst_3 = arith.constant 0.000000e+00 : f32
    %7 = vector.broadcast %cst_3 : f32 to vector<1x128xf32>
    %8 = arith.subf %7, %6 : vector<1x128xf32>
    %9 = math.exp %8 : vector<1x128xf32>
    %10 = math.log1p %9 : vector<1x128xf32>
    %11 = arith.addf %5, %10 : vector<1x128xf32>
    %c0_4 = arith.constant 0 : index
    %c0_5 = arith.constant 0 : index
    %12 = vector.load %arg3[%c0_4, %c0_5] : memref<1x128xf32, #tpu.memory_space<vmem>>, vector<1x128xf32>
    %13 = arith.mulf %11, %12 : vector<1x128xf32>
    %14 = vector.shape_cast %13 : vector<1x128xf32> to vector<1x1x128xf32>
    %cst_6 = arith.constant dense<0.000000e+00> : vector<1xf32>
    %15 = vector.multi_reduction <add>, %14, %cst_6 [1, 2] : vector<1x1x128xf32> to vector<1xf32>
    %16 = vector.shape_cast %15 : vector<1xf32> to vector<1x1x1xf32>
    %17 = vector.extract %16[0, 0, 0] : f32 from vector<1x1x1xf32>
    %c0_7 = arith.constant 0 : index
    %c0_8 = arith.constant 0 : index
    %18 = memref.load %arg4[%c0_7, %c0_8] : memref<1x1xf32, #tpu.memory_space<smem>>
    memref.store %17, %arg4[%c0_7, %c0_8] : memref<1x1xf32, #tpu.memory_space<smem>>
    return
  }
  func.func @transform_0(%arg0: i32) -> (i32, i32) {
    %c0_i32 = arith.constant 0 : i32
    %c0_i32_0 = arith.constant 0 : i32
    return %arg0, %c0_i32 : i32, i32
  }
  func.func @transform_1(%arg0: i32) -> (i32, i32) {
    %c0_i32 = arith.constant 0 : i32
    %c0_i32_0 = arith.constant 0 : i32
    return %arg0, %c0_i32 : i32, i32
  }
  func.func @transform_2(%arg0: i32) -> (i32, i32) {
    %c0_i32 = arith.constant 0 : i32
    %c0_i32_0 = arith.constant 0 : i32
    %c0_i32_1 = arith.constant 0 : i32
    return %c0_i32, %c0_i32_0 : i32, i32
  }
  func.func @transform_3(%arg0: i32) -> (i32, i32) {
    %c0_i32 = arith.constant 0 : i32
    %c0_i32_0 = arith.constant 0 : i32
    return %arg0, %c0_i32 : i32, i32
  }
}

</mosaic_0001>

<bundles_post_ra>
// kernel: tpu_custom_call.1
= control target key start
LH: loop header
LB: loop body
LE: loop exit
PB: predicated region body
PF: predicated region fallthrough
CT: control target
= control target key end

     0   :  { %8 = vsyncpa [#allocation3], 0  ;;  %s149_s0 = inlined_call_operand.hbm [shape: f32[1,128], index: 0, kind: input, shape index: {}]   ;;  %s150_s1 = inlined_call_operand.vmem [shape: f32[1,128], index: 1, kind: input, shape index: {}]   ;;  %s151_s2 = inlined_call_operand.vmem [shape: f32[1,128], index: 2, kind: input, shape index: {}]   ;;  %s152_s3 = inlined_call_operand.hbm [shape: f32[1,1], index: 3, kind: output, shape index: {}]  }
   0x1   :  { %9 = vsyncpa [#allocation4], 0  ;;  %s115_s12 = smov [#allocation2]  }
   0x2   :  { %s16_s13 = sshll.u32 %s115_s12, 4  ;;  %s17_s13 = int_to_ptr.vmem [resolvable:$true] %s16_s13 }
   0x3   :  { %s91_s14 = scalar_lea.vmem %s17_s13, 16  ;;  %s95_s15 = scalar_lea.vmem %s17_s13, 32 }
   0x4   :  { %p92_p0 = scmp.ne.s32.totalorder %s17_s13, %s91_s14  ;;  %p96_p1 = scmp.lt.s32.totalorder %s17_s13, %s17_s13 }
   0x5   :  { %p97_p2 = scmp.lt.s32.totalorder %s95_s15, %s91_s14 }
   0x7   :  { %p98_p3 = por %p97_p2, %p96_p1 }
   0x9   :  { %p99_p4 = pnand %p98_p3, %p92_p0 }
   0xb   :  { %102 = shalt.err (!%p99_p4)
}
   0xc   :  { %19 = dma.hbm_to_vmem [thread:$0]  %s149_s0, 16, %s17_s13, [#allocation3]  }
   0xd   :  { %111 = dma.done.wait [#allocation3], 16  }
   0xe   :  { %112 = vsyncadd [#allocation3], 4294967280  ;;  %v27_v0 = vld [vmem:[#allocation2] sm:$0x1]  ;;  %vm48_vm1 = vcmask 1040384   ;;  %s116_s21 = smov [#allocation5]  }
   0xf   :  { %v32_v1 = vand.u32 2147483647, %v27_v0  ;;  %v28_v7 = vld [vmem:[%s150_s1] sm:$0x1]  ;;  %v29_v9 = vmax.f32 %v27_v0, 0.0 }
  0x10   :  { %v30_v10 = vmul.f32 %v28_v7, %v27_v0  ;;  %v46_v17 = vld [vmem:[%s151_s2] sm:$0x1] }
  0x11   :  { %v33_v2 = vsub.f32 0.0, %v32_v1 }
  0x12   :  { %v31_v14 = vsub.f32 %v29_v9, %v30_v10 }
  0x13   :  { %v34_v3 = vmul.f32 1.442695, %v33_v2 }
  0x15   :  { %79 = vpow2.f32 %v34_v3 }
  0x22   :  { %v80_v4 = vpop.eup %79 }
  0x23   :  { %v36_v5 = vadd.f32 1.0, %v80_v4  ;;  %v39_v6 = vmul.f32 -0.5, %v80_v4  ;;  %v42_v11 = vand.u32 2147483647, %v80_v4 }
  0x25   :  { %81 = vlog2.f32 %v36_v5  ;;  %v40_v8 = vadd.f32 1.0, %v39_v6  ;;  %vm43_vm0 = vcmp.lt.f32.partialorder %v42_v11, 0.0004427343 }
  0x27   :  { %v41_v12 = vmul.f32 %v80_v4, %v40_v8 }
  0x32   :  { %v82_v13 = vpop.eup %81 }
  0x33   :  { %v38_v15 = vmul.f32 0.6931472, %v82_v13 }
  0x35   :  { %v44_v16 = vsel %vm43_vm0, %v41_v12, %v38_v15 }
  0x36   :  { %v45_v18 = vadd.f32 %v44_v16, %v31_v14 }
  0x38   :  { %v47_v19 = vmul.f32 %v46_v17, %v45_v18 }
  0x3a   :  { %v49_v20 = vsel %vm48_vm1, %v47_v19, 0.0 }
  0x3b   :  { %50 = vadd.xlane.f32.xlu0 %v49_v20 }
  0xc4   :  { %v51_v21 = vpop.xlane.xlu0 %50 }
  0xc5   :  { %v52_v22 = vrot.slane %v51_v21, 4 }
  0xc7   :  { %v53_v23 = vadd.f32 %v52_v22, %v51_v21 }
  0xc9   :  { %v54_v24 = vrot.slane %v53_v23, 2 }
  0xcb   :  { %v55_v25 = vadd.f32 %v54_v24, %v53_v23 }
  0xcd   :  { %v56_v26 = vrot.slane %v55_v25, 1 }
  0xcf   :  { %v57_v27 = vadd.f32 %v56_v26, %v55_v25 }
  0xd1   :  { %75 = vpush %v57_v27 }
 0x102   :  { %s76_s1 = spop %75 }
 0x103   :  { %60 = sst [smem:[#allocation5]] %s76_s1 }
 0x104   :  { %68 = dma.smem_to_hbm %s116_s21, 16, %s152_s3, [#allocation4]  }
 0x105   :  { %113 = dma.done.wait [#allocation4], 16  }
 0x106   :  { %114 = vsyncadd [#allocation4], 4294967280 }
 0x107   :  { %72 = sfence }
 0x108   :  { %73 = vsyncpa [#allocation3], 1 }
 0x109   :  { %74 = vsyncpa [#allocation4], 1 }

</bundles_post_ra>
